<compile_context>
chip_gen: v7x
topology: tpu7x:2x2x1
jax: 0.10.0
libtpu: 0.0.40
codegen_flags: <defaults>
</compile_context>

<pallas_src>
from functools import partial

import jax
import jax.numpy as jnp
from jax.experimental import pallas as pl
from jax.experimental.pallas import tpu as pltpu


def _round_up(x, m):
    return (x + m - 1) // m * m


def _vmem_limit(nbytes):
    # Generous floor (>= v5e scoped default), capped well under v7x's 64 MiB.
    return int(min(48 << 20, max(16 << 20, int(1.25 * nbytes) + (1 << 20))))


# ---------- Pass 1: conv GEMM tile (transposed) + per-tile BN partials --------

def _conv_stats_kernel(p_ref, w_ref, y_ref, s_ref):
    # (cout_p, k_p) bf16 @ (k_p, t_sp) bf16 -> (cout_p, t_sp) f32 on the MXU.
    acc = jnp.dot(w_ref[...], p_ref[0], preferred_element_type=jnp.float32)
    # bf16 intermediate halves the HBM round-trip; stats come from the f32 acc.
    y_ref[0] = acc.astype(y_ref.dtype)
    # Per-tile BN partials: lane-axis (XLU) reductions hidden under MXU slack.
    s_ref[0, 0, :, 0:1] = jnp.sum(acc, axis=1, keepdims=True)
    s_ref[0, 0, :, 1:2] = jnp.sum(acc * acc, axis=1, keepdims=True)


# ---------- Pass 2: per-channel affine (BatchNorm apply) ----------------------

def _bn_apply_kernel(y_ref, scale_ref, shift_ref, o_ref):
    o_ref[0] = y_ref[0].astype(jnp.float32) * scale_ref[...] + shift_ref[...]


# ---------- im2col (wrapper-side glue), transposed layout ---------------------
# TODO(synk): build patch tiles in-kernel (implicit GEMM: kh*kw / C_in-chunk
# grid axis marked "arbitrary" over a padded NHWC copy of x, f32 accumulator
# finalized with pl.when) or use allow_input_fusion, to remove the kh*kw (9x)
# HBM read amplification of this materialized im2col tensor.

def _im2col_t(x, kh, kw, stride, padding):
    """x: (N, C, H, W) -> patches_T (N, C*kh*kw, Ho*Wo), Ho, Wo (PyTorch K order)."""
    n, c, h, w = x.shape
    xp = jnp.pad(x, ((0, 0), (0, 0), (padding, padding), (padding, padding)))
    ho = (h + 2 * padding - kh) // stride + 1
    wo = (w + 2 * padding - kw) // stride + 1
    cols = []
    for di in range(kh):
        for dj in range(kw):
            cols.append(xp[:, :, di:di + ho * stride:stride, dj:dj + wo * stride:stride])
    p = jnp.stack(cols, axis=2)                    # (N, C, kh*kw, Ho, Wo)
    p = p.reshape(n, c * kh * kw, ho * wo)         # K index = c*kh*kw + di*kw + dj
    return p, ho, wo


def basic_conv2d(x, weight, gamma, beta, *, stride=1, padding=1, eps=1e-3):
    """x: (N, C_in, H, W) NCHW; weight: (C_out, C_in, kh, kw) PyTorch layout."""
    n_img, cin, h, w = x.shape
    cout, _, kh, kw = weight.shape

    # bf16 before im2col: halves the bytes moved by the stack/reshape HLOs.
    patches_t, ho, wo = _im2col_t(x.astype(jnp.bfloat16), kh, kw, stride, padding)
    _, k, howo = patches_t.shape

    # Padded GEMM shapes: C_out on sublanes (pad to 8 only), spatial on lanes.
    cout_p = _round_up(cout, 8)
    k_p = _round_up(k, 16)            # bf16 sublane packing on the contraction dim

    # Lane-tile sizing from an explicit VMEM budget (double-buffered blocks).
    budget = 24 << 20                                   # safe on v7x 64 MiB / v5e 16 MiB scoped
    w_bytes = 2 * cout_p * k_p * 2                      # double-buffered bf16 weight block
    per_col = 2 * 2 * (k_p + cout_p)                    # dbl-buf bf16 patches + bf16 out, per lane
    t_cap = max(128, min(4096, ((max(budget - w_bytes, per_col * 128)) // per_col) // 128 * 128))
    t_sp = min(_round_up(howo, 128), t_cap)             # pass-1 lane (spatial) tile
    howo_p = _round_up(howo, t_sp)                      # padded cols are zero -> no effect
    n_sp = howo_p // t_sp
    # TODO(synk): for very large K (k_p * t_sp exceeding the budget) add a K grid
    # axis (last, "arbitrary") with an f32 VMEM accumulator.

    # Single padded copies of the GEMM operands (bf16 MXU operands, f32 accum).
    patches_p = jnp.zeros((n_img, k_p, howo_p), jnp.bfloat16).at[:, :k, :howo].set(patches_t)
    w_mat = jnp.zeros((cout_p, k_p), jnp.bfloat16).at[:cout, :k].set(
        weight.reshape(cout, cin * kh * kw).astype(jnp.bfloat16))

    # ---- Pass 1: conv GEMM + per-tile BN partials -----------------------------
    vmem1 = 2 * (k_p * t_sp * 2 + cout_p * t_sp * 2 + cout_p * k_p * 2 + cout_p * 2 * 4)
    cost1 = pl.CostEstimate(
        flops=2 * n_img * cout_p * k_p * howo_p,
        transcendentals=0,
        bytes_accessed=(n_img * k_p * howo_p * 2 + cout_p * k_p * 2
                        + n_img * cout_p * howo_p * 2 + n_img * n_sp * cout_p * 2 * 4),
    )
    conv_t, stats = pl.pallas_call(
        _conv_stats_kernel,
        out_shape=(
            jax.ShapeDtypeStruct((n_img, cout_p, howo_p), jnp.bfloat16),
            jax.ShapeDtypeStruct((n_img, n_sp, cout_p, 2), jnp.float32),
        ),
        grid_spec=pltpu.PrefetchScalarGridSpec(
            num_scalar_prefetch=0,
            grid=(n_img, n_sp),
            in_specs=[
                pl.BlockSpec((1, k_p, t_sp), lambda i, s: (i, 0, s)),     # patches tile
                pl.BlockSpec((cout_p, k_p), lambda i, s: (0, 0)),         # full weight matrix
            ],
            out_specs=(
                pl.BlockSpec((1, cout_p, t_sp), lambda i, s: (i, 0, s)),  # bf16 conv tile
                pl.BlockSpec((1, 1, cout_p, 2), lambda i, s: (i, s, 0, 0)),  # per-tile stats
            ),
        ),
        compiler_params=pltpu.CompilerParams(
            dimension_semantics=("parallel", "parallel"),  # no resident state
            vmem_limit_bytes=_vmem_limit(vmem1),
        ),
        cost_estimate=cost1,
    )(patches_p, w_mat)

    # ---- Batch statistics -> per-channel scale/shift (tiny, plain JAX) --------
    # NOTE: E[x^2]-E[x]^2 in f32 is fine at these sizes; use centered/compensated
    # per-tile partials for very large M.
    tot = jnp.sum(stats, axis=(0, 1))            # (cout_p, 2)
    m_true = float(n_img * ho * wo)              # padded cols contributed exactly 0
    mean = tot[:, 0] / m_true
    var = tot[:, 1] / m_true - mean * mean       # biased batch variance
    gamma_p = jnp.zeros((cout_p,), jnp.float32).at[:cout].set(gamma.astype(jnp.float32))
    beta_p = jnp.zeros((cout_p,), jnp.float32).at[:cout].set(beta.astype(jnp.float32))
    scale = gamma_p * jax.lax.rsqrt(var + eps)
    shift = beta_p - mean * scale

    # ---- Pass 2: apply BatchNorm affine, large lane tiles ----------------------
    per_col2 = 2 * cout_p * (2 + 4)              # dbl-buf bf16 in + f32 out, per lane
    t2 = howo_p if howo_p * per_col2 <= budget else t_sp   # both divide howo_p
    n_sp2 = howo_p // t2
    vmem2 = t2 * per_col2 + 4 * cout_p * 4
    cost2 = pl.CostEstimate(
        flops=2 * n_img * cout_p * howo_p,
        transcendentals=0,
        bytes_accessed=n_img * cout_p * howo_p * (2 + 4) + 2 * cout_p * 4,
    )
    out_t = pl.pallas_call(
        _bn_apply_kernel,
        out_shape=jax.ShapeDtypeStruct((n_img, cout_p, howo_p), jnp.float32),
        grid_spec=pltpu.PrefetchScalarGridSpec(
            num_scalar_prefetch=0,
            grid=(n_img, n_sp2),
            in_specs=[
                pl.BlockSpec((1, cout_p, t2), lambda i, s: (i, 0, s)),
                pl.BlockSpec((cout_p, 1), lambda i, s: (0, 0)),
                pl.BlockSpec((cout_p, 1), lambda i, s: (0, 0)),
            ],
            out_specs=pl.BlockSpec((1, cout_p, t2), lambda i, s: (i, 0, s)),
        ),
        compiler_params=pltpu.CompilerParams(
            dimension_semantics=("parallel", "parallel"),
            vmem_limit_bytes=_vmem_limit(vmem2),
        ),
        cost_estimate=cost2,
    )(conv_t, scale.reshape(cout_p, 1), shift.reshape(cout_p, 1))

    # Output is already (N, C_out_p, Ho*Wo_p) in NCHW order: un-pad (no-op when
    # shapes already align, as here) and reshape -- no transpose pass.
    if cout_p != cout or howo_p != howo:
        out_t = out_t[:, :cout, :howo]
    return out_t.reshape(n_img, cout, ho, wo)


def _reference(x, weight, gamma, beta, *, stride=1, padding=1, eps=1e-3,
               match_kernel=False):
    cd = jnp.bfloat16 if match_kernel else jnp.float32
    y = jax.lax.conv_general_dilated(
        x.astype(cd), weight.astype(cd),
        window_strides=(stride, stride),
        padding=[(padding, padding), (padding, padding)],
        dimension_numbers=("NCHW", "OIHW", "NCHW"),
        preferred_element_type=jnp.float32,
    )
    mean = jnp.mean(y, axis=(0, 2, 3), keepdims=True)
    var = jnp.mean(y * y, axis=(0, 2, 3), keepdims=True) - mean * mean
    if match_kernel:
        y = y.astype(jnp.bfloat16).astype(jnp.float32)   # bf16 conv intermediate
    scale = gamma.reshape(1, -1, 1, 1) * jax.lax.rsqrt(var + eps)
    return y * scale + (beta.reshape(1, -1, 1, 1) - mean * scale)


if __name__ == "__main__":
    # BasicConv2d(in_channels=4, out_channels=8, kernel_size=3, padding=1)
    N, CIN, H, W = 2, 4, 16, 16
    COUT, KH, KW = 8, 3, 3

    key = jax.random.PRNGKey(0)
    kx, kw_, kg, kb = jax.random.split(key, 4)
    x = jax.random.normal(kx, (N, CIN, H, W), dtype=jnp.float32)
    weight = jax.random.normal(kw_, (COUT, CIN, KH, KW), dtype=jnp.float32) * 0.1
    gamma = 1.0 + 0.1 * jax.random.normal(kg, (COUT,), dtype=jnp.float32)
    beta = 0.1 * jax.random.normal(kb, (COUT,), dtype=jnp.float32)

    out = basic_conv2d(x, weight, gamma, beta, stride=1, padding=1, eps=1e-3)
    out = jax.block_until_ready(out)
    assert out.shape == (N, COUT, H, W)

    # Reference matched to bf16 MXU operands + bf16 intermediate — tight check.
    ref_bf16 = _reference(x, weight, gamma, beta, stride=1, padding=1, eps=1e-3,
                          match_kernel=True)
    assert jnp.allclose(out, ref_bf16, atol=2e-3, rtol=2e-3), \
        "mismatch vs bf16-matched JAX reference"

    # Full-f32 reference — only bf16 operand/intermediate rounding separates them.
    ref_f32 = _reference(x, weight, gamma, beta, stride=1, padding=1, eps=1e-3)
    assert jnp.allclose(out, ref_f32, atol=5e-2, rtol=5e-2), \
        "mismatch vs f32 JAX reference"

    print("KERNEL_OK")
</pallas_src>

<mosaic_0001>
module attributes {stable_mosaic.version = 11 : i64} {
  func.func @_conv_stats_kernel(%arg0: i32, %arg1: i32, %arg2: memref<1x48x256xbf16, #tpu.memory_space<vmem>>, %arg3: memref<8x48xbf16, #tpu.memory_space<vmem>>, %arg4: memref<1x8x256xbf16, #tpu.memory_space<vmem>>, %arg5: memref<1x1x8x2xf32, #tpu.memory_space<vmem>>) attributes {dimension_semantics = [#tpu.dimension_semantics<parallel>, #tpu.dimension_semantics<parallel>], iteration_bounds = array<i64: 2, 1>, scalar_prefetch = 0 : i64, scratch_operands = 0 : i64, tpu.core_type = #tpu.core_type<tc>, window_params = [{transform_indices = @transform_0, window_bounds = array<i64: 1, 48, 256>}, {pipeline_mode = #tpu.pipeline_mode<synchronous>, transform_indices = @transform_1, window_bounds = array<i64: 8, 48>}, {transform_indices = @transform_2, window_bounds = array<i64: 1, 8, 256>}, {transform_indices = @transform_3, window_bounds = array<i64: 1, 1, 8, 2>}]} {
    %c0 = arith.constant 0 : index
    %c0_0 = arith.constant 0 : index
    %0 = vector.load %arg3[%c0, %c0_0] : memref<8x48xbf16, #tpu.memory_space<vmem>>, vector<8x48xbf16>
    %c0_1 = arith.constant 0 : index
    %c0_2 = arith.constant 0 : index
    %c0_3 = arith.constant 0 : index
    %1 = vector.load %arg2[%c0_1, %c0_2, %c0_3] : memref<1x48x256xbf16, #tpu.memory_space<vmem>>, vector<1x48x256xbf16>
    %2 = vector.shape_cast %1 : vector<1x48x256xbf16> to vector<48x256xbf16>
    %cst = arith.constant dense<0.000000e+00> : vector<8x256xf32>
    %3 = tpu.matmul %0, %2, %cst {dimension_numbers = #tpu.dot_dimension_numbers<[1], [0], [0], [1], [0, 0, 1, 1], [], []>} : vector<8x48xbf16>, vector<48x256xbf16>, vector<8x256xf32> -> vector<8x256xf32>
    %4 = arith.truncf %3 : vector<8x256xf32> to vector<8x256xbf16>
    %c0_4 = arith.constant 0 : index
    %c0_5 = arith.constant 0 : index
    %c0_6 = arith.constant 0 : index
    %5 = vector.load %arg4[%c0_4, %c0_5, %c0_6] : memref<1x8x256xbf16, #tpu.memory_space<vmem>>, vector<1x8x256xbf16>
    %6 = vector.shape_cast %5 : vector<1x8x256xbf16> to vector<8x256xbf16>
    %7 = vector.shape_cast %4 : vector<8x256xbf16> to vector<1x8x256xbf16>
    tpu.vector_store %arg4[%c0_4, %c0_5, %c0_6], %7 {strides = array<i32>} : memref<1x8x256xbf16, #tpu.memory_space<vmem>>, vector<1x8x256xbf16>,
    %cst_7 = arith.constant dense<0.000000e+00> : vector<8xf32>
    %8 = vector.multi_reduction <add>, %3, %cst_7 [1] : vector<8x256xf32> to vector<8xf32>
    %9 = vector.shape_cast %8 : vector<8xf32> to vector<8x1xf32>
    %c0_8 = arith.constant 0 : index
    %c0_9 = arith.constant 0 : index
    %c0_10 = arith.constant 0 : index
    %c0_11 = arith.constant 0 : index
    %10 = vector.load %arg5[%c0_8, %c0_9, %c0_10, %c0_11] : memref<1x1x8x2xf32, #tpu.memory_space<vmem>>, vector<1x1x8x1xf32>
    %11 = vector.shape_cast %10 : vector<1x1x8x1xf32> to vector<8x1xf32>
    %12 = vector.shape_cast %9 : vector<8x1xf32> to vector<1x1x8x1xf32>
    tpu.vector_store %arg5[%c0_8, %c0_9, %c0_10, %c0_11], %12 {strides = array<i32>} : memref<1x1x8x2xf32, #tpu.memory_space<vmem>>, vector<1x1x8x1xf32>,
    %13 = arith.mulf %3, %3 : vector<8x256xf32>
    %cst_12 = arith.constant dense<0.000000e+00> : vector<8xf32>
    %14 = vector.multi_reduction <add>, %13, %cst_12 [1] : vector<8x256xf32> to vector<8xf32>
    %15 = vector.shape_cast %14 : vector<8xf32> to vector<8x1xf32>
    %c0_13 = arith.constant 0 : index
    %c0_14 = arith.constant 0 : index
    %c0_15 = arith.constant 0 : index
    %c1 = arith.constant 1 : index
    %16 = vector.load %arg5[%c0_13, %c0_14, %c0_15, %c1] : memref<1x1x8x2xf32, #tpu.memory_space<vmem>>, vector<1x1x8x1xf32>
    %17 = vector.shape_cast %16 : vector<1x1x8x1xf32> to vector<8x1xf32>
    %18 = vector.shape_cast %15 : vector<8x1xf32> to vector<1x1x8x1xf32>
    tpu.vector_store %arg5[%c0_13, %c0_14, %c0_15, %c1], %18 {strides = array<i32>} : memref<1x1x8x2xf32, #tpu.memory_space<vmem>>, vector<1x1x8x1xf32>,
    return
  }
  func.func @transform_0(%arg0: i32, %arg1: i32) -> (i32, i32, i32) {
    %c0_i32 = arith.constant 0 : i32
    %c0_i32_0 = arith.constant 0 : i32
    return %arg0, %c0_i32, %arg1 : i32, i32, i32
  }
  func.func @transform_1(%arg0: i32, %arg1: i32) -> (i32, i32) {
    %c0_i32 = arith.constant 0 : i32
    %c0_i32_0 = arith.constant 0 : i32
    %c0_i32_1 = arith.constant 0 : i32
    return %c0_i32, %c0_i32_0 : i32, i32
  }
  func.func @transform_2(%arg0: i32, %arg1: i32) -> (i32, i32, i32) {
    %c0_i32 = arith.constant 0 : i32
    %c0_i32_0 = arith.constant 0 : i32
    return %arg0, %c0_i32, %arg1 : i32, i32, i32
  }
  func.func @transform_3(%arg0: i32, %arg1: i32) -> (i32, i32, i32, i32) {
    %c0_i32 = arith.constant 0 : i32
    %c0_i32_0 = arith.constant 0 : i32
    %c0_i32_1 = arith.constant 0 : i32
    return %arg0, %arg1, %c0_i32, %c0_i32_0 : i32, i32, i32, i32
  }
}

</mosaic_0001>

<bundles_post_ra>
// kernel: tpu_custom_call.1
= control target key start
LH: loop header
LB: loop body
LE: loop exit
PB: predicated region body
PF: predicated region fallthrough
CT: control target
= control target key end

     0   :  { %9 = vsyncpa [#allocation3], 0  ;;  %s1001_s0 = inlined_call_operand.hbm [shape: bf16[2,48,256], index: 0, kind: input, shape index: {}]   ;;  %s1002_s1 = inlined_call_operand.hbm [shape: bf16[8,48], index: 1, kind: input, shape index: {}]   ;;  %s1003_s2 = inlined_call_operand.hbm [shape: bf16[2,8,256], index: 2, kind: output, shape index: {0}]   ;;  %s1004_s3 = inlined_call_operand.vmem [shape: f32[2,1,8,2], index: 3, kind: output, shape index: {1}]  }
   0x1   :  { %11 = vsyncpa [#allocation3 + $0x1], 0 }
   0x2   :  { %12 = vsyncpa [#allocation6], 0 }
   0x3   :  { %13 = vsyncpa [#allocation4], 0 }
   0x4   :  { %15 = vsyncpa [#allocation4 + $0x1], 0  ;;  %s782_s12 = smov 0   ;;  %s784_s13 = smov 0  }
   0x5   :  { %s786_s14 = smov 0   ;;  %s788_s15 = smov 0  }
   0x6   :  { %s790_s16 = smov 0   ;;  %s792_s17 = smov 0  }
   0x7 LB: > { %s497_s18 = sadd.s32 4294967295, %s754_s17   ;;  %s498_s19 = sadd.s32 4294967294, %s754_s17   ;;  %s754_s17 = sphi %s792_s17, %s21_s17   ;;  %s750_s16 = sphi %s790_s16, %s1032_s16   ;;  %s746_s15 = sphi %s788_s15, %s1031_s15   ;;  %s742_s14 = sphi %s786_s14, %s1030_s14   ;;  %s738_s13 = sphi %s784_s13, %s1029_s13   ;;  %s734_s12 = sphi %s782_s12, %s1028_s12  }
   0x8   : > { %s42_s20 = sadd.s32 1, %s742_s14  ;;  %p49_p0 = scmp.ne.s32.totalorder %s742_s14, %s738_s13 }
   0x9   : > { %p50_p1 = scmp.eq.s32.totalorder %s754_s17, 0  ;;  %p55_p2 = scmp.ne.s32.totalorder %s738_s13, %s734_s12 }
   0xa   : > { %p820_p3 = scmp.eq.s32.totalorder %s497_s18, 0  ;;  %p102_p4 = scmp.eq.s32.totalorder %s497_s18, 1 }
   0xb   : > { %p824_p5 = por %p50_p1, %p49_p0  ;;  %p108_p6 = scmp.eq.s32.totalorder %s498_s19, 1 }
   0xc   : > { %s1011_s21 = scalar_select %p820_p3, 1, 0 }
   0xd   : > { %p830_p7 = por %p820_p3, %p55_p2  ;;  %p834_p8 = por %p102_p4, %p49_p0 }
   0xe   : > { %p838_p9 = por %p108_p6, %p55_p2  ;;  %p499_p10 = scmp.ge.s32.totalorder %s754_s17, 1 }
   0xf   : > { %s1013_s23 = scalar_select %p830_p7, 1, 0 }
  0x10   : > { %s1014_s24 = scalar_select %p834_p8, 1, 0 }
  0x11   : > { %s1015_s25 = scalar_select %p838_p9, 1, 0 }
  0x12   : > { %p143_p11 = scmp.lt.s32.totalorder %s754_s17, 3  ;;  %s756_s27 = smov [#allocation5]  }
  0x13   : > { %s156_s28 = sshll.u32 %s756_s27, 4  ;;  %p546_p1 = scmp.lt.s32.totalorder %s754_s17, 2  ;;  %s157_s28 = int_to_ptr.vmem [resolvable:$true] %s156_s28 }
  0x14   : > { %p845_p13 = pnand %p499_p10, %p143_p11  ;;  %s33_s4 = sadd.s32 1, %s750_s16 }
  0x15   : > { %p854_p4 = pnand %p546_p1, %p824_p5  ;;  %p865_p6 = scmp.ge.s32.totalorder %s33_s4, 2 }
  0x16   : > { %s1016_s26 = scalar_select %p845_p13, 1, 0 }
  0x17   : > { %p533_p0 = pneg %p845_p13  ;;  %s167_s6 = sand.u32 1, %s742_s14  }
  0x18   : > { %s1017_s29 = scalar_select %p854_p4, 1, 0 }
  0x19   : > { %p860_p2 = pnand %p533_p0, %p820_p3  ;;  %s610_s9 = scalar_lea.hbm %s1002_s1, 64 }
  0x1a   : > { %s1019_s5 = scalar_select %p865_p6, 1, 0 }
  0x1b   : > { %p611_p5 = scmp.ne.s32.totalorder %s1002_s1, %s610_s9  ;;  %p612_p10 = pneg %p860_p2 }
  0x1c   : > { %p617_p0 = scmp.lt.u32.totalorder %s610_s9, %s1002_s1 }
  0x1d   : > { %p613_p11 = pnand %p612_p10, %p611_p5 }
  0x1f   : > { %p614_p1 = pneg %p613_p11 }
  0x21   : > { %p619_p12 = pnand %p617_p0, %p614_p1 }
  0x23   : > { %622 = shalt.err (!%p619_p12)
}
  0x24   : > { %s623_s22 = scalar_lea.vmem %s157_s28, 64  ;;  %p631_p7 = scmp.lt.s32.totalorder %s157_s28, %s157_s28 }
  0x25   : > { %p624_p9 = scmp.ne.s32.totalorder %s157_s28, %s623_s22  ;;  %p632_p13 = scmp.lt.s32.totalorder %s623_s22, %s623_s22 }
  0x27   : > { %p626_p8 = pnand %p624_p9, %p612_p10  ;;  %p633_p4 = por %p632_p13, %p631_p7 }
  0x29   : > { %p627_p3 = pneg %p626_p8 }
  0x2b   : > { %p634_p6 = pnand %p633_p4, %p627_p3 }
  0x2d   : > { %637 = shalt.err (!%p634_p6)
}
  0x2e   : > { %536 = dma.hbm_to_vmem [thread:$0]  (!%p860_p2), %s1002_s1, 64, %s157_s28, [#allocation6]  }
  0x2f   : > { %p1020_p9 = scmp.ne.s32.totalorder %s1019_s5, 0  ;;  %s522_s8 = smul.u32 48, %s167_s6 }
  0x30   : > { %s523_s10 = smul.u32 768, %s750_s16  ;;  %s905_s5 = scalar_lea.sflag [#allocation3], %s167_s6 }
  0x31   : > { %s1034_s4 = smov (%p1020_p9, %s33_s4), 0  ;;  %s171_s19 = scalar_lea.vmem [#allocation2], %s522_s8 }
  0x32   : > { %s37_s9 = ssub.s32 %s750_s16, %s1034_s4  ;;  %s896_s18 = scalar_lea.hbm %s1001_s0, %s523_s10 }
  0x33   : > { %p40_p3 = scmp.eq.s32.totalorder %s37_s9, 0  ;;  %s180_s22 = sshll.u32 %s171_s19, 4  ;;  %s903_s22 = int_to_ptr.vmem [resolvable:$true] %s180_s22 }
  0x34   : > { %s638_s27 = scalar_lea.hbm %s896_s18, 768  ;;  %p1021_p8 = scmp.ne.s32.totalorder %s1017_s29, 0 }
  0x35   : > { %s901_s28 = scalar_select %p40_p3, %s742_s14, %s42_s20  }
  0x36   : > { %p639_p7 = scmp.ne.s32.totalorder %s896_s18, %s638_s27  ;;  %p640_p12 = pneg %p1021_p8 }
  0x37   : > { %s643_s8 = scalar_lea.hbm %s1001_s0, 1536  ;;  %p644_p2 = scmp.lt.u32.totalorder %s896_s18, %s1001_s0 }
  0x38   : > { %p641_p13 = pnand %p640_p12, %p639_p7  ;;  %p645_p6 = scmp.lt.u32.totalorder %s643_s8, %s638_s27 }
  0x39   : > { %p647_p10 = scmp.lt.u32.totalorder %s638_s27, %s896_s18 }
  0x3a   : > { %p642_p4 = pneg %p641_p13  ;;  %p646_p5 = por %p645_p6, %p644_p2 }
  0x3c   : > { %p648_p11 = por %p647_p10, %p646_p5 }
  0x3e   : > { %p649_p1 = pnand %p648_p11, %p642_p4 }
  0x40   : > { %652 = shalt.err (!%p649_p1)
}
  0x41   : > { %s653_s20 = scalar_lea.vmem %s903_s22, 768  ;;  %s757_s6 = smov [#allocation2]  }
  0x42   : > { %p654_p0 = scmp.ne.s32.totalorder %s903_s22, %s653_s20  ;;  %s658_s11 = sshll.u32 %s757_s6, 4  ;;  %s659_s11 = int_to_ptr.vmem [resolvable:$false] %s658_s11 }
  0x43   : > { %s660_s19 = scalar_lea.vmem %s659_s11, 1536  ;;  %p661_p7 = scmp.lt.s32.totalorder %s903_s22, %s659_s11 }
  0x44   : > { %p656_p9 = pnand %p654_p0, %p640_p12  ;;  %p662_p13 = scmp.lt.s32.totalorder %s660_s19, %s653_s20 }
  0x46   : > { %p657_p3 = pneg %p656_p9  ;;  %p663_p2 = por %p662_p13, %p661_p7 }
  0x48   : > { %p664_p6 = pnand %p663_p2, %p657_p3 }
  0x4a   : > { %667 = shalt.err (!%p664_p6)
}
  0x4b   : > { %s758_s27 = smov 128   ;;  %s759_s7 = smov 8  }
  0x4c   : > { %540 = dma.hbm_to_vmem [thread:$0]  (!%p1021_p8), %s896_s18, 768, %s903_s22, %s905_s5, %s758_s27, %s758_s27, %s759_s7  }
  0x4d   : > { %p1022_p12 = scmp.ne.s32.totalorder %s1016_s26, 0 }
  0x4e   : > { %s936_s9 = sand.u32 (!%p1022_p12), 1, %s738_s13   ;;  %p1023_p4 = scmp.ne.s32.totalorder (!%p1022_p12), %s1013_s23, 0 }
  0x4f   : > { %192 = sbr.rel (%p1022_p12) target bundleno = 465 (0x1d1), region = 28  ;;  %s195_s10 = scalar_lea.sflag (!%p1022_p12), [#allocation3], %s936_s9 }
  0x50   : > { %s524_s8 = smul.u32 (!%p1022_p12), 48, %s936_s9 }
  0x52   : > { %s198_s30 = scalar_lea.vmem (!%p1022_p12), [#allocation2], %s524_s8 }
  0x56   : > { %721 = dma.done.wait (%p1023_p4), %s195_s10, 768  }
  0x57   : > { %723 = vsyncadd (%p1023_p4), %s195_s10, 4294966528  ;;  %p1024_p5 = scmp.ne.s32.totalorder %s1011_s21, 0 }
  0x59   : > { %725 = dma.done.wait (%p1024_p5), [#allocation6], 64  }
  0x5a   : > { %727 = vsyncadd (%p1024_p5), [#allocation6], 4294967232  ;;  %v760_v0 = vmov 0   ;;  %v601_v1 = vld [vmem:[%s198_s30 + $0x4] ss:$8 sps:$4 sm:$0xff]   ;;  %vm279_vm0 = vcmask 392192  }
  0x5b   : > { %315 = vmatprep.mubr.bf16.mxu0 %v760_v0  ;;  %v603_v2 = vld [vmem:[%s198_s30] ss:$8 sps:$4 sm:$0xff]   ;;  %283 = vmatprep.subr.bf16.mxu0 %v601_v1  ;;  %v604_v3 = vld [vmem:[%s198_s30 + $0x14] ss:$8 sps:$4 sm:$0xff]   ;;  %v606_v4 = vld [vmem:[%s198_s30 + $0x10] ss:$8 sps:$4 sm:$0xff]  }
  0x5c   : > { %284 = vmatpush1.bf16.msra.mxu0 %v603_v2  ;;  %v607_v5 = vld [vmem:[%s198_s30 + $0x24] ss:$8 sps:$4 sm:$0xff]   ;;  %v609_v6 = vld [vmem:[%s198_s30 + $0x20] ss:$8 sps:$4 sm:$0xff]   ;;  %s505_s21 = sshll.u32 %s936_s9, 3  ;;  %s521_s26 = sshll.u32 %s746_s15, 7 }
  0x5d   : > { %285 = vmatprep.subr.bf16.mxu0 %v604_v3  ;;  %v242_v7 = vld [vmem:[#allocation5] sm:$0xf]  ;;  %s222_s23 = scalar_lea.vmem [#allocation7], %s505_s21  ;;  %s953_s5 = scalar_lea.hbm %s1003_s2, %s521_s26 }
  0x5e   : > { %s369_s29 = sshll.u32 %s222_s23, 4  ;;  %s346_s20 = scalar_lea.sflag [#allocation4], %s936_s9  ;;  %s370_s29 = int_to_ptr.vmem [resolvable:$true] %s369_s29 }
  0x5f   : > { %s668_s6 = scalar_lea.vmem %s370_s29, 128  ;;  %p1025_p10 = scmp.ne.s32.totalorder %s1014_s24, 0 }
  0x60   : > { %286 = vmatpush1.bf16.msra.mxu0 %v606_v4  ;;  %p669_p8 = scmp.ne.s32.totalorder %s370_s29, %s668_s6  ;;  %s761_s11 = smov [#allocation7]  }
  0x61   : > { %287 = vmatprep.subr.bf16.mxu0 %v607_v5  ;;  %s672_s19 = sshll.u32 %s761_s11, 4  ;;  %s673_s19 = int_to_ptr.vmem [resolvable:$false] %s672_s19 }
  0x62   : > { %p670_p11 = pnand %p669_p8, %p1025_p10  ;;  %s674_s27 = scalar_lea.vmem %s673_s19, 256 }
  0x63   : > { %p675_p0 = scmp.lt.s32.totalorder %s370_s29, %s673_s19  ;;  %p676_p9 = scmp.lt.s32.totalorder %s674_s27, %s668_s6 }
  0x64   : > { %288 = vmatpush1.bf16.msra.mxu0 %v609_v6  ;;  %p671_p1 = pneg %p670_p11 }
  0x65   : > { %p677_p3 = por %p676_p9, %p675_p0 }
  0x67   : > { %513 = vmatmul.mubr.msk.bf16.vlgmr.msra.gmra.mrb[0].mxu0 %vm279_vm0, %v242_v7  ;;  %p678_p7 = pnand %p677_p3, %p671_p1 }
 0x13a   : > { %v317_v8 = vpop.f32.mrb[0].mxu0 }
 0x13b   : > { %v319_v9 = vpop.f32.mrb[1].mxu0  ;;  %v338_v10 = vmul.f32 %v317_v8, %v317_v8 }
 0x13c   : > { %v520_v11 = vpack.c.bf16 %v319_v9, %v317_v8  ;;  %v321_v12 = vpop.f32.mrb[2].mxu0  ;;  %v333_v13 = vadd.f32 %v319_v9, %v317_v8  ;;  %v339_v14 = vmul.f32 %v319_v9, %v319_v9 }
 0x13d   : > { %v322_v15 = vpop.f32.mrb[3].mxu0 }
 0x13e   : > { %334 = vadd.xlane.f32.xlu0 %v333_v13  ;;  %v340_v16 = vadd.f32 %v339_v14, %v338_v10  ;;  %332 = vst [vmem:[%s222_s23] sm:$0xff] %v520_v11 }
 0x142   : > { %341 = vadd.xlane.f32.xlu0 %v340_v16 }
 0x143   : > { %681 = shalt.err (!%p678_p7)
}
 0x144   : > { %s682_s7 = scalar_lea.hbm %s953_s5, 128  ;;  %s686_s10 = scalar_lea.hbm %s1003_s2, 256 }
 0x145   : > { %p683_p13 = scmp.ne.s32.totalorder %s953_s5, %s682_s7  ;;  %p687_p12 = scmp.lt.u32.totalorder %s953_s5, %s1003_s2 }
 0x146   : > { %p688_p4 = scmp.lt.u32.totalorder %s686_s10, %s682_s7  ;;  %p690_p8 = scmp.lt.u32.totalorder %s682_s7, %s953_s5 }
 0x147   : > { %p684_p2 = pnand %p683_p13, %p1025_p10 }
 0x148   : > { %p689_p5 = por %p688_p4, %p687_p12 }
 0x149   : > { %p685_p6 = pneg %p684_p2 }
 0x14a   : > { %p691_p11 = por %p690_p8, %p689_p5 }
 0x14c   : > { %p692_p1 = pnand %p691_p11, %p685_p6 }
 0x14e   : > { %695 = shalt.err (!%p692_p1)
}
 0x14f   : > { %531 = dma.vmem_to_hbm [thread:$0]  (%p1025_p10), %s370_s29, 128, %s953_s5, %s346_s20   ;;  %vm336_vm1 = vcmask 7168   ;;  %vm343_vm2 = vcmask 15368  }
 0x150   : > { %p234_p0 = scmp.lt.s32.totalorder %s746_s15, 1 }
 0x152   : > { %s1036_s15 = smov (!%p234_p0, %s746_s15), 1 }
 0x153   : > { %s506_s23 = sshll.u32 %s1036_s15, 3 }
 0x154   : > { %s240_s22 = scalar_lea.vmem %s1004_s3, %s506_s23 }
 0x1cb   : > { %v335_v17 = vpop.xlane.xlu0 %334 }
 0x1cc   : > { %337 = vst.msk [vmem:[%s240_s22] sm:$0xff] %vm336_vm1, %v335_v17 }
 0x1cf   : > { %v342_v18 = vpop.xlane.xlu0 %341 }
 0x1d0   : > { %344 = vst.msk [vmem:[%s240_s22] sm:$0xff] %vm343_vm2, %v342_v18 }
 0x1d1 PF: > { %s384_s24 = sand.u32 1, %s734_s12   ;;  %p1026_p9 = scmp.ne.s32.totalorder %s1015_s25, 0 }
 0x1d2   : > { %p1027_p10 = scmp.ge.s32.totalorder %s754_s17, 2  ;;  %s385_s29 = scalar_lea.sflag [#allocation4], %s384_s24 }
 0x1d4   : > { %p542_p3 = pnand %p1027_p10, %p1026_p9 }
 0x1d6   : > { %729 = dma.done.wait (!%p542_p3), %s385_s29, 128  }
 0x1d7   : > { %731 = vsyncadd (!%p542_p3), %s385_s29, 4294967168  ;;  %s21_s17 = sadd.s32 1, %s754_s17   ;;  %s1028_s12 = smov %s738_s13 }
 0x1d8   : > { %p18_p7 = scmp.ge.s32.totalorder %s21_s17, 4   ;;  %s1029_s13 = smov %s742_s14 }
 0x1d9   : > { %s1030_s14 = smov %s901_s28  ;;  %s1031_s15 = smov %s750_s16 }
 0x1da   : > { %s1032_s16 = smov %s1034_s4  ;;  %20 = sbr.rel (!%p18_p7) target bundleno = 7 (0x7), region = 89 }
 0x1e1   :  { %400 = vsyncpa [#allocation3], 1 }
 0x1e2   :  { %402 = vsyncpa [#allocation3 + $0x1], 1 }
 0x1e3   :  { %403 = vsyncpa [#allocation6], 1 }
 0x1e4   :  { %404 = vsyncpa [#allocation4], 1 }
 0x1e5   :  { %406 = vsyncpa [#allocation4 + $0x1], 1 }

</bundles_post_ra>
